<compile_context>
chip_gen: v5e
topology: v5e:2x2
jax: 0.10.0
libtpu: 0.0.40
codegen_flags: <defaults>
</compile_context>

<pallas_src>
import jax
import jax.numpy as jnp
from jax import lax
from jax.experimental import pallas as pl
from jax.experimental.pallas import tpu as pltpu


# ----------------------------------------------------------------------------
# Pallas kernel: fused MLP (all layers) on one natural-layout (tile_m, d) block.
# ----------------------------------------------------------------------------
def _make_tmlp_kernel(num_layers, inner_chunk):
    def kernel(x_ref, *refs):
        # refs = (w0, b0, w1, b1, ..., w_{L-1}, b_{L-1}, o_ref); weights are (in, out).
        o_ref = refs[-1]

        # Tiny resident weights/biases: load once per grid step, compute in f32.
        wbs = []
        for l in range(num_layers):
            w = refs[2 * l][...].astype(jnp.float32)        # (d_in_l, d_out_l)
            b = refs[2 * l + 1][...].astype(jnp.float32)    # (1, d_out_l)
            wbs.append((w, b))

        tile_m = x_ref.shape[0]
        cm = inner_chunk if (0 < inner_chunk < tile_m and tile_m % inner_chunk == 0) else tile_m
        n_chunks = tile_m // cm

        def chunk_body(c, carry):
            r0 = pl.multiple_of(c * cm, cm)
            # M on sublanes, features on lanes; f32 accumulation on the MXU.
            h = x_ref[pl.ds(r0, cm), :].astype(jnp.float32)          # (cm, d_in)
            for l, (w, b) in enumerate(wbs):
                h = jnp.dot(h, w, preferred_element_type=jnp.float32) + b
                if l != num_layers - 1:
                    h = jnp.maximum(h, 0.0)                          # ReLU (VPU, f32)
            o_ref[pl.ds(r0, cm), :] = h.astype(o_ref.dtype)
            return carry

        if n_chunks == 1:
            chunk_body(0, 0)
        else:
            # Bounded vreg working set per iteration; partial unroll for LLO visibility.
            lax.fori_loop(0, n_chunks, chunk_body, 0, unroll=min(n_chunks, 8))

    return kernel


# ----------------------------------------------------------------------------
# Tiling / VMEM budgeting helpers.
# ----------------------------------------------------------------------------
def _step_vmem_bytes(tile_m, in_bytes, out_bytes):
    # x / out blocks are lane-padded to 128 in VMEM and double-buffered by Pallas.
    rows = ((tile_m + 7) // 8) * 8
    return 2 * rows * 128 * in_bytes + 2 * rows * 128 * out_bytes


def _pick_tile_m(M, in_bytes, out_bytes, max_tile=8192, vmem_budget=40 << 20):
    """Large, aligned row tile; even step count when multi-step (v7x dual-TC)."""
    if M <= 256:
        return M  # single full block (block == full dim is always legal), grid = 1
    # Shrink the cap until the double-buffered blocks fit comfortably in VMEM
    # (keeps headroom on v7x's 64 MiB physical VMEM).
    while max_tile > 512 and _step_vmem_bytes(max_tile, in_bytes, out_bytes) > vmem_budget:
        max_tile //= 2
    # Smallest even step count whose tiles fit under the cap -> biggest tiles,
    # balanced halves across v7x's two TensorCores; no-op on v5e/v6e (1 TC).
    steps = 2
    while pl.cdiv(M, steps) > max_tile:
        steps += 2
    return ((pl.cdiv(M, steps) + 127) // 128) * 128


def _vmem_limit_bytes(tile_m, in_bytes, out_bytes):
    est = _step_vmem_bytes(tile_m, in_bytes, out_bytes) + (4 << 20)  # weights + spill slack
    return int(min(max(est, 32 << 20), 56 << 20))


# ----------------------------------------------------------------------------
# pallas_call wrapper (natural (M, dim_in) layout; no transposes, no padding).
# ----------------------------------------------------------------------------
def tmlp_forward_pallas(x2d, params, *, tile_m=None, inner_chunk=512, out_dtype=None):
    """x2d: (M, dim_in).  params: list of ((in, out) weight, (1, out) bias)."""
    M, dim_in = x2d.shape
    num_layers = len(params)
    dim_out = params[-1][0].shape[1]
    out_dtype = x2d.dtype if out_dtype is None else out_dtype
    in_bytes = jnp.dtype(x2d.dtype).itemsize
    out_bytes = jnp.dtype(out_dtype).itemsize

    if tile_m is None:
        tile_m = _pick_tile_m(M, in_bytes, out_bytes)
    if tile_m >= M:
        tile_m = M                      # single full block
    elif tile_m % 8 != 0:
        tile_m = max(8, (tile_m // 8) * 8)

    grid = pl.cdiv(M, tile_m)           # ragged tail handled by Pallas boundary masking

    in_specs = [pl.BlockSpec((tile_m, dim_in), lambda i: (i, 0))]
    flat_params = []
    for (w, b) in params:
        flat_params += [w, b]
        # Full-array blocks with constant index_map: tiny weights/biases stay
        # resident in VMEM across the whole grid (no re-DMA per step).
        in_specs.append(pl.BlockSpec(w.shape, lambda i: (0, 0)))
        in_specs.append(pl.BlockSpec(b.shape, lambda i: (0, 0)))
    out_spec = pl.BlockSpec((tile_m, dim_out), lambda i: (i, 0))

    flops = 2 * M * sum(int(w.shape[0]) * int(w.shape[1]) for w, _ in params)
    param_bytes = sum(int(w.size) * jnp.dtype(w.dtype).itemsize
                      + int(b.size) * jnp.dtype(b.dtype).itemsize for w, b in params)
    bytes_accessed = M * dim_in * in_bytes + M * dim_out * out_bytes + param_bytes

    return pl.pallas_call(
        _make_tmlp_kernel(num_layers, inner_chunk),
        out_shape=jax.ShapeDtypeStruct((M, dim_out), out_dtype),
        grid_spec=pl.GridSpec(grid=(grid,), in_specs=in_specs, out_specs=out_spec),
        compiler_params=pltpu.CompilerParams(
            dimension_semantics=("parallel",),
            vmem_limit_bytes=_vmem_limit_bytes(tile_m, in_bytes, out_bytes)),
        cost_estimate=pl.CostEstimate(
            flops=flops, transcendentals=0, bytes_accessed=bytes_accessed),
    )(x2d, *flat_params)


# ----------------------------------------------------------------------------
# Parameter construction (deterministic, mirrors TMLP.__init__).
# ----------------------------------------------------------------------------
def init_tmlp_params(key, dim_in, dim_out, dim_hidden, num_layers):
    """Returns list of (v (out,in), g (out,1), bias (out,)) per layer."""
    params = []
    for l in range(num_layers):
        d_in = dim_in if l == 0 else dim_hidden
        d_out = dim_out if l == num_layers - 1 else dim_hidden
        key, kw, kb = jax.random.split(key, 3)
        bound = 1.0 / jnp.sqrt(d_in)  # torch.nn.Linear default init bound
        v = jax.random.uniform(kw, (d_out, d_in), jnp.float32, -bound, bound)
        b = jax.random.uniform(kb, (d_out,), jnp.float32, -bound, bound)
        if l == 0:
            # constant_(lin.weight[:, 3:], 0.) / constant_(lin.bias[3:], 0.)
            # is applied BEFORE the weight_norm wrap in the reference module.
            v = v.at[:, 3:].set(0.0)
            b = b.at[3:].set(0.0)
        g = jnp.sqrt(jnp.sum(v * v, axis=1, keepdims=True))  # weight_norm init: g = ||v||
        params.append((v, g, b))
    return params


def materialize_weight_norm(params, storage_dtype=jnp.float32):
    """W_eff = g * v / ||v||_row, stored pre-transposed ((in, out) weight, (1, out) bias).

    Hoisted out of the hot path: compute once, reuse across tmlp_apply calls.
    Note: an all-zero row of v would give NaN/Inf, exactly like PyTorch weight_norm
    (with the layer-0 init only columns 3: are zeroed, so rows keep nonzero norm).
    Use storage_dtype=jnp.bfloat16 to halve HBM traffic; in-kernel math stays f32.
    """
    out = []
    for (v, g, b) in params:
        norm = jnp.sqrt(jnp.sum(v * v, axis=1, keepdims=True))
        w_eff = (g * v / norm)                                  # (out, in), f32
        out.append((w_eff.T.astype(storage_dtype),              # (in, out)
                    b.reshape(1, -1).astype(storage_dtype)))    # (1, out)
    return out


def tmlp_apply(x, kernel_params, *, tile_m=None, inner_chunk=512, out_dtype=None):
    """x: (..., dim_in) -> (..., dim_out). Reshapes only (layout-free); no transposes."""
    dim_in = x.shape[-1]
    dim_out = kernel_params[-1][0].shape[1]
    lead = x.shape[:-1]
    x2d = x.reshape(-1, dim_in)
    y2d = tmlp_forward_pallas(x2d, kernel_params, tile_m=tile_m,
                              inner_chunk=inner_chunk, out_dtype=out_dtype)
    return y2d.reshape(*lead, dim_out)


# Pure-JAX reference for sanity checks (f32).
def tmlp_reference(x, kernel_params):
    h = x.reshape(-1, x.shape[-1]).astype(jnp.float32)
    for l, (w, b) in enumerate(kernel_params):
        h = h @ w.astype(jnp.float32) + b.astype(jnp.float32)
        if l != len(kernel_params) - 1:
            h = jnp.maximum(h, 0.0)
    return h.reshape(*x.shape[:-1], kernel_params[-1][0].shape[1])


if __name__ == "__main__":
    dim_in, dim_out, dim_hidden, num_layers = 4, 8, 32, 3

    key = jax.random.PRNGKey(0)
    key, kx = jax.random.split(key)
    # x: (batch=2, points=16, dim_in=4); Linear acts on the last axis.
    x = jax.random.normal(kx, (2, 16, dim_in), jnp.float32)

    params = init_tmlp_params(key, dim_in, dim_out, dim_hidden, num_layers)

    # 1) f32 storage, single full block, tight tolerance.
    kp32 = materialize_weight_norm(params, jnp.float32)
    y = jax.block_until_ready(tmlp_apply(x, kp32))
    y_ref = tmlp_reference(x, kp32)
    assert y.shape == (2, 16, dim_out)
    assert jnp.allclose(y, y_ref, atol=1e-5, rtol=1e-5)

    # 2) Multi-step grid + ragged tail: M=300, tile_m=128 -> grid=3, last block partial
    #    (no jnp.pad / output slice; boundary handled by the grid).
    key, kx2 = jax.random.split(key)
    x_rag = jax.random.normal(kx2, (300, dim_in), jnp.float32)
    y_rag = jax.block_until_ready(tmlp_apply(x_rag, kp32, tile_m=128))
    assert y_rag.shape == (300, dim_out)
    assert jnp.allclose(y_rag, tmlp_reference(x_rag, kp32), atol=1e-5, rtol=1e-5)

    # 3) bf16 storage (halves HBM traffic); accumulation stays f32 in-kernel.
    kp16 = materialize_weight_norm(params, jnp.bfloat16)
    y16 = jax.block_until_ready(tmlp_apply(x.astype(jnp.bfloat16), kp16))
    assert float(jnp.max(jnp.abs(y16.astype(jnp.float32) - y_ref))) < 0.2

    print("KERNEL_OK")
</pallas_src>

<mosaic_0001>
module attributes {stable_mosaic.version = 11 : i64} {
  func.func @kernel(%arg0: i32, %arg1: memref<32x4xf32, #tpu.memory_space<vmem>>, %arg2: memref<4x32xf32, #tpu.memory_space<vmem>>, %arg3: memref<1x32xf32, #tpu.memory_space<vmem>>, %arg4: memref<32x32xf32, #tpu.memory_space<vmem>>, %arg5: memref<1x32xf32, #tpu.memory_space<vmem>>, %arg6: memref<32x8xf32, #tpu.memory_space<vmem>>, %arg7: memref<1x8xf32, #tpu.memory_space<vmem>>, %arg8: memref<32x8xf32, #tpu.memory_space<vmem>>) attributes {dimension_semantics = [#tpu.dimension_semantics<parallel>], iteration_bounds = array<i64: 1>, scalar_prefetch = 0 : i64, scratch_operands = 0 : i64, tpu.core_type = #tpu.core_type<tc>, window_params = [{transform_indices = @transform_0, window_bounds = array<i64: 32, 4>}, {pipeline_mode = #tpu.pipeline_mode<synchronous>, transform_indices = @transform_1, window_bounds = array<i64: 4, 32>}, {pipeline_mode = #tpu.pipeline_mode<synchronous>, transform_indices = @transform_2, window_bounds = array<i64: 1, 32>}, {pipeline_mode = #tpu.pipeline_mode<synchronous>, transform_indices = @transform_3, window_bounds = array<i64: 32, 32>}, {pipeline_mode = #tpu.pipeline_mode<synchronous>, transform_indices = @transform_4, window_bounds = array<i64: 1, 32>}, {pipeline_mode = #tpu.pipeline_mode<synchronous>, transform_indices = @transform_5, window_bounds = array<i64: 32, 8>}, {pipeline_mode = #tpu.pipeline_mode<synchronous>, transform_indices = @transform_6, window_bounds = array<i64: 1, 8>}, {transform_indices = @transform_7, window_bounds = array<i64: 32, 8>}]} {
    %c0 = arith.constant 0 : index
    %c0_0 = arith.constant 0 : index
    %0 = vector.load %arg2[%c0, %c0_0] : memref<4x32xf32, #tpu.memory_space<vmem>>, vector<4x32xf32>
    %c0_1 = arith.constant 0 : index
    %c0_2 = arith.constant 0 : index
    %1 = vector.load %arg3[%c0_1, %c0_2] : memref<1x32xf32, #tpu.memory_space<vmem>>, vector<1x32xf32>
    %c0_3 = arith.constant 0 : index
    %c0_4 = arith.constant 0 : index
    %2 = vector.load %arg4[%c0_3, %c0_4] : memref<32x32xf32, #tpu.memory_space<vmem>>, vector<32x32xf32>
    %c0_5 = arith.constant 0 : index
    %c0_6 = arith.constant 0 : index
    %3 = vector.load %arg5[%c0_5, %c0_6] : memref<1x32xf32, #tpu.memory_space<vmem>>, vector<1x32xf32>
    %c0_7 = arith.constant 0 : index
    %c0_8 = arith.constant 0 : index
    %4 = vector.load %arg6[%c0_7, %c0_8] : memref<32x8xf32, #tpu.memory_space<vmem>>, vector<32x8xf32>
    %c0_9 = arith.constant 0 : index
    %c0_10 = arith.constant 0 : index
    %5 = vector.load %arg7[%c0_9, %c0_10] : memref<1x8xf32, #tpu.memory_space<vmem>>, vector<1x8xf32>
    %c0_i32 = arith.constant 0 : i32
    %6 = tpu.assume_multiple %c0_i32, 32 : i32
    %7 = arith.index_cast %6 : i32 to index
    %c0_11 = arith.constant 0 : index
    %8 = vector.load %arg1[%7, %c0_11] : memref<32x4xf32, #tpu.memory_space<vmem>>, vector<32x4xf32>
    %cst = arith.constant dense<0.000000e+00> : vector<32x32xf32>
    %9 = tpu.matmul %8, %0, %cst {dimension_numbers = #tpu.dot_dimension_numbers<[1], [0], [0], [1], [0, 0, 1, 1], [], []>} : vector<32x4xf32>, vector<4x32xf32>, vector<32x32xf32> -> vector<32x32xf32>
    %10 = vector.broadcast %1 : vector<1x32xf32> to vector<32x32xf32>
    %11 = arith.addf %9, %10 : vector<32x32xf32>
    %cst_12 = arith.constant 0.000000e+00 : f32
    %12 = vector.broadcast %cst_12 : f32 to vector<32x32xf32>
    %13 = arith.maximumf %11, %12 : vector<32x32xf32>
    %cst_13 = arith.constant dense<0.000000e+00> : vector<32x32xf32>
    %14 = tpu.matmul %13, %2, %cst_13 {dimension_numbers = #tpu.dot_dimension_numbers<[1], [0], [0], [1], [0, 0, 1, 1], [], []>} : vector<32x32xf32>, vector<32x32xf32>, vector<32x32xf32> -> vector<32x32xf32>
    %15 = vector.broadcast %3 : vector<1x32xf32> to vector<32x32xf32>
    %16 = arith.addf %14, %15 : vector<32x32xf32>
    %cst_14 = arith.constant 0.000000e+00 : f32
    %17 = vector.broadcast %cst_14 : f32 to vector<32x32xf32>
    %18 = arith.maximumf %16, %17 : vector<32x32xf32>
    %cst_15 = arith.constant dense<0.000000e+00> : vector<32x8xf32>
    %19 = tpu.matmul %18, %4, %cst_15 {dimension_numbers = #tpu.dot_dimension_numbers<[1], [0], [0], [1], [0, 0, 1, 1], [], []>} : vector<32x32xf32>, vector<32x8xf32>, vector<32x8xf32> -> vector<32x8xf32>
    %20 = vector.broadcast %5 : vector<1x8xf32> to vector<32x8xf32>
    %21 = arith.addf %19, %20 : vector<32x8xf32>
    %22 = arith.index_cast %6 : i32 to index
    %c0_16 = arith.constant 0 : index
    %23 = vector.load %arg8[%22, %c0_16] : memref<32x8xf32, #tpu.memory_space<vmem>>, vector<32x8xf32>
    tpu.vector_store %arg8[%22, %c0_16], %21 {strides = array<i32>} : memref<32x8xf32, #tpu.memory_space<vmem>>, vector<32x8xf32>,
    return
  }
  func.func @transform_0(%arg0: i32) -> (i32, i32) {
    %c0_i32 = arith.constant 0 : i32
    %c0_i32_0 = arith.constant 0 : i32
    return %arg0, %c0_i32 : i32, i32
  }
  func.func @transform_1(%arg0: i32) -> (i32, i32) {
    %c0_i32 = arith.constant 0 : i32
    %c0_i32_0 = arith.constant 0 : i32
    %c0_i32_1 = arith.constant 0 : i32
    return %c0_i32, %c0_i32_0 : i32, i32
  }
  func.func @transform_2(%arg0: i32) -> (i32, i32) {
    %c0_i32 = arith.constant 0 : i32
    %c0_i32_0 = arith.constant 0 : i32
    %c0_i32_1 = arith.constant 0 : i32
    return %c0_i32, %c0_i32_0 : i32, i32
  }
  func.func @transform_3(%arg0: i32) -> (i32, i32) {
    %c0_i32 = arith.constant 0 : i32
    %c0_i32_0 = arith.constant 0 : i32
    %c0_i32_1 = arith.constant 0 : i32
    return %c0_i32, %c0_i32_0 : i32, i32
  }
  func.func @transform_4(%arg0: i32) -> (i32, i32) {
    %c0_i32 = arith.constant 0 : i32
    %c0_i32_0 = arith.constant 0 : i32
    %c0_i32_1 = arith.constant 0 : i32
    return %c0_i32, %c0_i32_0 : i32, i32
  }
  func.func @transform_5(%arg0: i32) -> (i32, i32) {
    %c0_i32 = arith.constant 0 : i32
    %c0_i32_0 = arith.constant 0 : i32
    %c0_i32_1 = arith.constant 0 : i32
    return %c0_i32, %c0_i32_0 : i32, i32
  }
  func.func @transform_6(%arg0: i32) -> (i32, i32) {
    %c0_i32 = arith.constant 0 : i32
    %c0_i32_0 = arith.constant 0 : i32
    %c0_i32_1 = arith.constant 0 : i32
    return %c0_i32, %c0_i32_0 : i32, i32
  }
  func.func @transform_7(%arg0: i32) -> (i32, i32) {
    %c0_i32 = arith.constant 0 : i32
    %c0_i32_0 = arith.constant 0 : i32
    return %arg0, %c0_i32 : i32, i32
  }
}

</mosaic_0001>

<bundles_post_ra>
// kernel: tpu_custom_call.1
= control target key start
LH: loop header
LB: loop body
LE: loop exit
PB: predicated region body
PF: predicated region fallthrough
CT: control target
= control target key end

     0   :  { %vm58_vm0 = vcmask 1043456   ;;  %vm45_vm1 = vcmask 31744   ;;  %vm98_vm2 = vcmask 261120   ;;  %vm188_vm3 = vcmask 64512   ;;  %s329_s1 = inlined_call_operand.vmem [shape: f32[4,32], index: 1, kind: input, shape index: {}]   ;;  %s330_s0 = inlined_call_operand.vmem [shape: f32[32,4], index: 0, kind: input, shape index: {}]   ;;  %s331_s3 = inlined_call_operand.vmem [shape: f32[32,32], index: 3, kind: input, shape index: {}]   ;;  %s332_s2 = inlined_call_operand.vmem [shape: f32[1,32], index: 2, kind: input, shape index: {}]   ;;  %s333_s4 = inlined_call_operand.vmem [shape: f32[1,32], index: 4, kind: input, shape index: {}]   ;;  %s334_s5 = inlined_call_operand.vmem [shape: f32[32,8], index: 5, kind: input, shape index: {}]   ;;  %s335_s6 = inlined_call_operand.vmem [shape: f32[1,8], index: 6, kind: input, shape index: {}]   ;;  %s336_s7 = inlined_call_operand.vmem [shape: f32[32,8], index: 7, kind: output, shape index: {}]  }
   0x1   :  { %v26_v0 = vld [vmem:[%s329_s1] sm:$0xf]  ;;  %v31_v2 = vld [vmem:[%s331_s3 + $0x18] sm:$0xff]  ;;  %v39_v3 = vld [vmem:[%s330_s0 + $0x8] sm:$0xff] }
   0x2   :  { %v38_v1 = vld [vmem:[%s330_s0] sm:$0xff]  ;;  %197 = vmatpush.msk.msra.mxu0 %vm58_vm0, %v26_v0  ;;  %123 = vmatpush.msra.mxu1 %v31_v2  ;;  %v40_v4 = vld [vmem:[%s330_s0 + $0x10] sm:$0xff]  ;;  %v41_v5 = vld [vmem:[%s330_s0 + $0x18] sm:$0xff] }
   0x3   :  { %198 = vmatmul.msk.f32.vlgmr.msra.gmra.mxu0 %vm45_vm1, %v38_v1  ;;  %210 = vmatpush.msra.mxu3 %v31_v2  ;;  %v30_v6 = vld [vmem:[%s331_s3 + $0x10] sm:$0xff]  ;;  %v29_v7 = vld [vmem:[%s331_s3 + $0x8] sm:$0xff]  ;;  %v28_v8 = vld [vmem:[%s331_s3] sm:$0xff] }
   0x4   :  { %124 = vmatpush.msra.mxu1 %v30_v6  ;;  %v218_v9 = vld [vmem:[%s332_s2] ss:$0 sm:$0xff]  ;;  %v36_v10 = vld [vmem:[%s334_s5 + $0x18] sm:$0xff]  ;;  %v35_v23 = vld [vmem:[%s334_s5 + $0x10] sm:$0xff] }
   0x5   :  { %211 = vmatpush.msra.mxu3 %v30_v6  ;;  %214 = vmatpush.msra.mxu2 %v36_v10  ;;  %v34_v24 = vld [vmem:[%s334_s5 + $0x8] sm:$0xff]  ;;  %v33_v25 = vld [vmem:[%s334_s5] sm:$0xff] }
   0x6   :  { %125 = vmatpush.msra.mxu1 %v29_v7  ;;  %v219_v26 = vld [vmem:[%s333_s4] ss:$0 sm:$0xff] }
   0x7   :  { %212 = vmatpush.msra.mxu3 %v29_v7  ;;  %215 = vmatpush.msra.mxu2 %v35_v23  ;;  %v220_v39 = vld [vmem:[%s335_s6] ss:$0 sm:$0xff] }
   0x8   :  { %126 = vmatpush.msra.mxu1 %v28_v8 }
   0x9   :  { %213 = vmatpush.msra.mxu3 %v28_v8  ;;  %216 = vmatpush.msra.mxu2 %v34_v24 }
   0xa   :  { %171 = vmatpush.msrb.mxu1 %v36_v10 }
   0xb   :  { %199 = vmatmul.msk.f32.gmra.mxu0 %vm45_vm1, %v39_v3  ;;  %217 = vmatpush.msra.mxu2 %v33_v25 }
   0xc   :  { %172 = vmatpush.msrb.mxu1 %v35_v23 }
   0xe   :  { %173 = vmatpush.msrb.mxu1 %v34_v24 }
  0x10   :  { %174 = vmatpush.msrb.mxu1 %v33_v25 }
  0x13   :  { %200 = vmatmul.msk.f32.gmra.mxu0 %vm45_vm1, %v40_v4 }
  0x1b   :  { %201 = vmatmul.msk.f32.gmra.mxu0 %vm45_vm1, %v41_v5 }
  0x80   :  { %v79_v11 = vpop.f32.mrf.mxu0 }
  0x81   :  { %v80_v12 = vadd.f32 %v218_v9, %v79_v11 }
  0x83   :  { %v91_v13 = vmax.f32 %v80_v12, 0.0 }
  0x85   :  { %202 = vmatmul.msk.f32.vlgmr.msra.gmra.mxu1 %vm98_vm2, %v91_v13 }
  0x88   :  { %v82_v14 = vpop.f32.mrf.mxu0 }
  0x89   :  { %v83_v15 = vadd.f32 %v218_v9, %v82_v14 }
  0x8b   :  { %v92_v16 = vmax.f32 %v83_v15, 0.0 }
  0x8d   :  { %203 = vmatmul.msk.f32.vlgmr.msra.gmra.mxu3 %vm98_vm2, %v92_v16 }
  0x90   :  { %v85_v17 = vpop.f32.mrf.mxu0 }
  0x91   :  { %v86_v18 = vadd.f32 %v218_v9, %v85_v17 }
  0x93   :  { %v93_v19 = vmax.f32 %v86_v18, 0.0 }
  0x95   :  { %204 = vmatmul.msk.f32.gmra.mxu3 %vm98_vm2, %v93_v19 }
  0x98   :  { %v88_v20 = vpop.f32.mrf.mxu0 }
  0x99   :  { %v89_v21 = vadd.f32 %v218_v9, %v88_v20 }
  0x9b   :  { %v94_v22 = vmax.f32 %v89_v21, 0.0 }
  0x9d   :  { %205 = vmatmul.msk.f32.gmra.mxu3 %vm98_vm2, %v94_v22 }
 0x102   :  { %v128_v27 = vpop.f32.mrf.mxu1 }
 0x103   :  { %v129_v28 = vadd.f32 %v219_v26, %v128_v27 }
 0x105   :  { %v140_v29 = vmax.f32 %v129_v28, 0.0 }
 0x107   :  { %206 = vmatmul.msk.f32.vlgmr.msrb.gmra.mxu1 %vm98_vm2, %v140_v29 }
 0x110   :  { %v131_v30 = vpop.f32.mrf.mxu3 }
 0x111   :  { %v132_v31 = vadd.f32 %v219_v26, %v131_v30 }
 0x113   :  { %v141_v32 = vmax.f32 %v132_v31, 0.0 }
 0x115   :  { %207 = vmatmul.msk.f32.vlgmr.msra.gmra.mxu2 %vm98_vm2, %v141_v32 }
 0x118   :  { %v134_v33 = vpop.f32.mrf.mxu3 }
 0x119   :  { %v135_v34 = vadd.f32 %v219_v26, %v134_v33 }
 0x11b   :  { %v142_v35 = vmax.f32 %v135_v34, 0.0 }
 0x11d   :  { %208 = vmatmul.msk.f32.gmra.mxu2 %vm98_vm2, %v142_v35 }
 0x120   :  { %v137_v36 = vpop.f32.mrf.mxu3 }
 0x121   :  { %v138_v37 = vadd.f32 %v219_v26, %v137_v36 }
 0x123   :  { %v143_v38 = vmax.f32 %v138_v37, 0.0 }
 0x125   :  { %209 = vmatmul.msk.f32.gmra.mxu2 %vm98_vm2, %v143_v38 }
 0x184   :  { %v176_v40 = vpop.f32.mrf.mxu1 }
 0x185   :  { %v177_v41 = vadd.f32 %v220_v39, %v176_v40 }
 0x187   :  { %189 = vst.msk [vmem:[%s336_s7] sm:$0xff] %vm188_vm3, %v177_v41 }
 0x198   :  { %v179_v42 = vpop.f32.mrf.mxu2 }
 0x199   :  { %v180_v43 = vadd.f32 %v220_v39, %v179_v42 }
 0x19b   :  { %190 = vst.msk [vmem:[%s336_s7 + $0x8] sm:$0xff] %vm188_vm3, %v180_v43 }
 0x1a0   :  { %v182_v44 = vpop.f32.mrf.mxu2 }
 0x1a1   :  { %v183_v45 = vadd.f32 %v220_v39, %v182_v44 }
 0x1a3   :  { %191 = vst.msk [vmem:[%s336_s7 + $0x10] sm:$0xff] %vm188_vm3, %v183_v45 }
 0x1a8   :  { %v185_v46 = vpop.f32.mrf.mxu2 }
 0x1a9   :  { %v186_v47 = vadd.f32 %v220_v39, %v185_v46 }
 0x1ab   :  { %192 = vst.msk [vmem:[%s336_s7 + $0x18] sm:$0xff] %vm188_vm3, %v186_v47 }

</bundles_post_ra>
